<compile_context>
chip_gen: v7x
topology: tpu7x:2x2x1
jax: 0.10.0
libtpu: 0.0.40
codegen_flags: <defaults>
</compile_context>

<pallas_src>
import functools

import jax
import jax.numpy as jnp
from jax.experimental import pallas as pl
from jax.experimental.pallas import tpu as pltpu


def _round_up(n, m):
    return (n + m - 1) // m * m


def _cheb_kan_kernel(xt_ref, c_ref, ot_ref, *, degree):
    """One (output-tile, batch-tile) block of the Chebyshev KAN forward.

    xt_ref: (I, TB)          transposed input tile (batch on the lane axis)
    c_ref:  (TO, (D+1)*I)    flattened coeffs, K ordered degree-major then input
    ot_ref: (TO, TB)         transposed output tile
    """
    # tanh + Chebyshev recurrence in f32 regardless of the input dtype.
    x = jnp.tanh(xt_ref[...].astype(jnp.float32))            # (I, TB)
    ts = [jnp.ones_like(x), x]                                # T_0, T_1
    for _ in range(2, degree + 1):
        ts.append(2.0 * x * ts[-1] - ts[-2])                  # T_n = 2 x T_{n-1} - T_{n-2}
    # Stack along the sublane (major) axis -> ((degree+1)*I, TB).  Sublane
    # concatenation of I-row blocks (I is the full second-minor dim), no lane
    # movement needed.
    t = jnp.concatenate(ts, axis=0)

    # Single MXU matmul with K = (degree+1)*input_dim folded into the
    # contraction; accumulate in f32.  If coeffs are bf16, feed the MXU bf16.
    c = c_ref[...]
    mxu_dtype = c.dtype if c.dtype == jnp.bfloat16 else jnp.float32
    acc = jnp.dot(c.astype(mxu_dtype), t.astype(mxu_dtype),
                  preferred_element_type=jnp.float32)         # (TO, TB)
    ot_ref[...] = acc.astype(ot_ref.dtype)


def chebyshev_kan_layer(x, coeffs, degree, *, block_b=512, block_o=256):
    """x: (B, input_dim); coeffs: (output_dim, input_dim, degree+1) -> (B, output_dim)."""
    B, I = x.shape
    O = coeffs.shape[0]
    assert coeffs.shape == (O, I, degree + 1)
    # The PyTorch forward always builds T_0 and T_1 (its einsum would fail for
    # degree == 0), so require degree >= 1.
    assert degree >= 1

    K = (degree + 1) * I
    out_dtype = jnp.promote_types(x.dtype, coeffs.dtype)

    # coeffs (O, I, D+1) -> (O, K) with c_flat[o, d*I + i] = coeffs[o, i, d],
    # matching the degree-major stacking of T inside the kernel.
    c_flat = jnp.transpose(coeffs, (0, 2, 1)).reshape(O, K)

    # Batch tile (lane axis of the transposed problem): multiple of 128.
    tb = min(_round_up(B, 128), block_b)
    b_pad = _round_up(B, tb)
    # Output tile (sublane axis): multiple of 8.
    o_pad8 = _round_up(O, 8)
    to = min(o_pad8, block_o)
    o_pad = _round_up(o_pad8, to)

    xt = jnp.pad(x.T, ((0, 0), (0, b_pad - B)))           # (I, B_pad), native dtype
    c_p = jnp.pad(c_flat, ((0, o_pad - O), (0, 0)))       # (O_pad, K), native dtype

    grid = (o_pad // to, b_pad // tb)

    x_item = jnp.dtype(x.dtype).itemsize
    c_item = jnp.dtype(coeffs.dtype).itemsize
    o_item = jnp.dtype(out_dtype).itemsize

    # Rough VMEM budget: double-buffered x / coeff / out tiles + f32 working set
    # for the stacked T matrix.  Clamp to v7x's 64 MiB physical VMEM.
    vmem_bytes = 2 * (I * tb * x_item + to * K * c_item + to * tb * o_item)
    vmem_bytes += 4 * K * tb * 4
    vmem_limit = int(min(max(4 * vmem_bytes, 16 * 1024 * 1024), 64 * 1024 * 1024))

    cost = pl.CostEstimate(
        flops=2 * b_pad * o_pad * K,
        transcendentals=b_pad * I * (o_pad // to),
        bytes_accessed=(x.size * x_item + coeffs.size * c_item + B * O * o_item),
    )

    out_t = pl.pallas_call(
        functools.partial(_cheb_kan_kernel, degree=degree),
        out_shape=jax.ShapeDtypeStruct((o_pad, b_pad), out_dtype),
        grid=grid,
        in_specs=[
            # x^T tile: varies with the inner (batch) axis -> double-buffered.
            pl.BlockSpec((I, tb), lambda o, b: (0, b)),
            # coeff tile: constant over the inner batch axis -> stays resident.
            pl.BlockSpec((to, K), lambda o, b: (o, 0)),
        ],
        out_specs=pl.BlockSpec((to, tb), lambda o, b: (o, b)),
        compiler_params=pltpu.CompilerParams(
            dimension_semantics=("parallel", "parallel"),
            vmem_limit_bytes=vmem_limit,
        ),
        cost_estimate=cost,
    )(xt, c_p)

    return out_t[:O, :B].T


def _reference(x, coeffs, degree):
    """Pure-JAX reference matching the PyTorch forward (degree >= 1)."""
    x_norm = jnp.tanh(x.astype(jnp.float32))
    Tx = [jnp.ones_like(x_norm)]
    if degree >= 1:
        Tx.append(x_norm)
    for _ in range(2, degree + 1):
        Tx.append(2.0 * x_norm * Tx[-1] - Tx[-2])
    T_stack = jnp.stack(Tx, axis=-1)                      # (B, I, D+1)
    return jnp.einsum("bid,oid->bo", T_stack, coeffs.astype(jnp.float32))


if __name__ == "__main__":
    # Small shapes consistent with the module: x is (batch, input_dim).
    batch, input_dim, output_dim, degree = 8, 32, 16, 3

    key = jax.random.PRNGKey(0)
    kx, kc = jax.random.split(key)
    x = jax.random.normal(kx, (batch, input_dim), dtype=jnp.float32)
    # Deterministic synthetic parameter matching nn.Parameter(torch.randn(O, I, D+1)).
    coeffs = jax.random.normal(kc, (output_dim, input_dim, degree + 1),
                               dtype=jnp.float32)

    out = chebyshev_kan_layer(x, coeffs, degree)
    out = jax.block_until_ready(out)

    ref = _reference(x, coeffs, degree)
    assert out.shape == (batch, output_dim)
    assert jnp.allclose(out, ref, atol=1e-3, rtol=1e-3), "mismatch vs reference"

    print("KERNEL_OK")
</pallas_src>

<mosaic_0001>
module attributes {stable_mosaic.version = 11 : i64} {
  func.func @_cheb_kan_kernel(%arg0: i32, %arg1: i32, %arg2: memref<32x128xf32, #tpu.memory_space<vmem>>, %arg3: memref<16x128xf32, #tpu.memory_space<vmem>>, %arg4: memref<16x128xf32, #tpu.memory_space<vmem>>) attributes {dimension_semantics = [#tpu.dimension_semantics<parallel>, #tpu.dimension_semantics<parallel>], iteration_bounds = array<i64: 1, 1>, scalar_prefetch = 0 : i64, scratch_operands = 0 : i64, tpu.core_type = #tpu.core_type<tc>, window_params = [{transform_indices = @transform_0, window_bounds = array<i64: 32, 128>}, {transform_indices = @transform_1, window_bounds = array<i64: 16, 128>}, {transform_indices = @transform_2, window_bounds = array<i64: 16, 128>}]} {
    %c0 = arith.constant 0 : index
    %c0_0 = arith.constant 0 : index
    %0 = vector.load %arg2[%c0, %c0_0] : memref<32x128xf32, #tpu.memory_space<vmem>>, vector<32x128xf32>
    %1 = math.tanh %0 : vector<32x128xf32>
    %cst = arith.constant 1.000000e+00 : f32
    %2 = vector.broadcast %cst : f32 to vector<32x128xf32>
    %cst_1 = arith.constant 2.000000e+00 : f32
    %3 = vector.broadcast %cst_1 : f32 to vector<32x128xf32>
    %4 = arith.mulf %3, %1 : vector<32x128xf32>
    %5 = arith.mulf %4, %1 : vector<32x128xf32>
    %6 = arith.subf %5, %2 : vector<32x128xf32>
    %cst_2 = arith.constant 2.000000e+00 : f32
    %7 = vector.broadcast %cst_2 : f32 to vector<32x128xf32>
    %8 = arith.mulf %7, %1 : vector<32x128xf32>
    %9 = arith.mulf %8, %6 : vector<32x128xf32>
    %10 = arith.subf %9, %1 : vector<32x128xf32>
    %11 = tpu.concatenate %2, %1, %6, %10 in 0 : vector<32x128xf32>, vector<32x128xf32>, vector<32x128xf32>, vector<32x128xf32> -> vector<128x128xf32>
    %c0_3 = arith.constant 0 : index
    %c0_4 = arith.constant 0 : index
    %12 = vector.load %arg3[%c0_3, %c0_4] : memref<16x128xf32, #tpu.memory_space<vmem>>, vector<16x128xf32>
    %cst_5 = arith.constant dense<0.000000e+00> : vector<16x128xf32>
    %13 = tpu.matmul %12, %11, %cst_5 {dimension_numbers = #tpu.dot_dimension_numbers<[1], [0], [0], [1], [0, 0, 1, 1], [], []>} : vector<16x128xf32>, vector<128x128xf32>, vector<16x128xf32> -> vector<16x128xf32>
    %c0_6 = arith.constant 0 : index
    %c0_7 = arith.constant 0 : index
    %14 = vector.load %arg4[%c0_6, %c0_7] : memref<16x128xf32, #tpu.memory_space<vmem>>, vector<16x128xf32>
    tpu.vector_store %arg4[%c0_6, %c0_7], %13 {strides = array<i32>} : memref<16x128xf32, #tpu.memory_space<vmem>>, vector<16x128xf32>,
    return
  }
  func.func @transform_0(%arg0: i32, %arg1: i32) -> (i32, i32) {
    %c0_i32 = arith.constant 0 : i32
    %c0_i32_0 = arith.constant 0 : i32
    return %c0_i32, %arg1 : i32, i32
  }
  func.func @transform_1(%arg0: i32, %arg1: i32) -> (i32, i32) {
    %c0_i32 = arith.constant 0 : i32
    %c0_i32_0 = arith.constant 0 : i32
    return %arg0, %c0_i32 : i32, i32
  }
  func.func @transform_2(%arg0: i32, %arg1: i32) -> (i32, i32) {
    %c0_i32 = arith.constant 0 : i32
    return %arg0, %arg1 : i32, i32
  }
}

</mosaic_0001>

<bundles_post_ra>
// kernel: tpu_custom_call.1
= control target key start
LH: loop header
LB: loop body
LE: loop exit
PB: predicated region body
PF: predicated region fallthrough
CT: control target
= control target key end

     0   :  { %7 = vsyncpa [#allocation3], 0  ;;  %s402_s0 = inlined_call_operand.hbm [shape: f32[32,128], index: 0, kind: input, shape index: {}]   ;;  %s403_s1 = inlined_call_operand.hbm [shape: f32[16,128], index: 1, kind: input, shape index: {}]   ;;  %s404_s2 = inlined_call_operand.hbm [shape: f32[16,128], index: 2, kind: output, shape index: {}]  }
   0x1   :  { %8 = vsyncpa [#allocation6], 0 }
   0x2   :  { %9 = vsyncpa [#allocation4], 0  ;;  %s336_s9 = smov [#allocation2]   ;;  %s264_s13 = scalar_lea.hbm %s402_s0, 512 }
   0x3   :  { %s15_s10 = sshll.u32 %s336_s9, 4  ;;  %p265_p0 = scmp.ne.s32.totalorder %s402_s0, %s264_s13  ;;  %s16_s10 = int_to_ptr.vmem [resolvable:$true] %s15_s10 }
   0x4   :  { %p268_p1 = scmp.lt.u32.totalorder %s264_s13, %s402_s0 }
   0x6   :  { %p270_p2 = pnand %p268_p1, %p265_p0 }
   0x8   :  { %273 = shalt.err (!%p270_p2)
}
   0x9   :  { %s274_s18 = scalar_lea.vmem %s16_s10, 512  ;;  %p279_p4 = scmp.lt.s32.totalorder %s16_s10, %s16_s10 }
   0xa   :  { %p275_p3 = scmp.ne.s32.totalorder %s16_s10, %s274_s18  ;;  %p280_p5 = scmp.lt.s32.totalorder %s274_s18, %s274_s18 }
   0xc   :  { %p281_p6 = por %p280_p5, %p279_p4 }
   0xe   :  { %p282_p7 = pnand %p281_p6, %p275_p3 }
  0x10   :  { %285 = shalt.err (!%p282_p7)
}
  0x11   :  { %s337_s19 = smov 128   ;;  %s338_s20 = smov 8  }
  0x12   :  { %21 = dma.hbm_to_vmem [thread:$0]  %s402_s0, 512, %s16_s10, [#allocation3], %s337_s19, %s337_s19, %s338_s20  }
  0x13   :  { %s339_s23 = smov [#allocation5]   ;;  %s286_s27 = scalar_lea.hbm %s403_s1, 256 }
  0x14   :  { %s27_s24 = sshll.u32 %s339_s23, 4  ;;  %p287_p8 = scmp.ne.s32.totalorder %s403_s1, %s286_s27  ;;  %s28_s24 = int_to_ptr.vmem [resolvable:$true] %s27_s24 }
  0x15   :  { %p290_p9 = scmp.lt.u32.totalorder %s286_s27, %s403_s1 }
  0x17   :  { %p292_p10 = pnand %p290_p9, %p287_p8 }
  0x19   :  { %295 = shalt.err (!%p292_p10)
}
  0x1a   :  { %s296_s4 = scalar_lea.vmem %s28_s24, 256  ;;  %p301_p12 = scmp.lt.s32.totalorder %s28_s24, %s28_s24 }
  0x1b   :  { %p297_p11 = scmp.ne.s32.totalorder %s28_s24, %s296_s4  ;;  %p302_p13 = scmp.lt.s32.totalorder %s296_s4, %s296_s4 }
  0x1d   :  { %p303_p0 = por %p302_p13, %p301_p12 }
  0x1f   :  { %p304_p1 = pnand %p303_p0, %p297_p11 }
  0x21   :  { %307 = shalt.err (!%p304_p1)
}
  0x22   :  { %33 = dma.hbm_to_vmem [thread:$0]  %s403_s1, 256, %s28_s24, [#allocation6], %s337_s19, %s337_s19, %s338_s20  }
  0x23   :  { %330 = dma.done.wait [#allocation3], 512  }
  0x24   :  { %331 = vsyncadd [#allocation3], 4294966784 }
  0x25   :  { %332 = dma.done.wait [#allocation6], 256  }
  0x26   :  { %333 = vsyncadd [#allocation6], 4294967040  ;;  %v340_v0 = vmov 1.0|1.0   ;;  %v40_v1 = vld [vmem:[#allocation2] sm:$0xff]  ;;  %v41_v2 = vld [vmem:[#allocation2 + $0x8] sm:$0xff] }
  0x27   :  { %222 = vmatprep.subr.bf16.mxu0 %v340_v0  ;;  %v42_v3 = vld [vmem:[#allocation2 + $0x10] sm:$0xff]  ;;  %256 = vtanh.f32 %v40_v1  ;;  %v43_v4 = vld [vmem:[#allocation2 + $0x18] sm:$0xff]  ;;  %v68_v5 = vld [vmem:[#allocation5] sm:$0xff]  ;;  %s341_s1 = smov [#allocation7]  }
  0x28   :  { %223 = vmatpush3.bf16.msra.mxu0 %v340_v0  ;;  %258 = vtanh.f32 %v41_v2  ;;  %219 = vmatprep.mubr.f32.mxu0 %v68_v5  ;;  %v69_v36 = vld [vmem:[#allocation5 + $0x8] sm:$0xff]  ;;  %s152_s6 = sshll.u32 %s341_s1, 4  ;;  %s153_s6 = int_to_ptr.vmem [resolvable:$true] %s152_s6 }
  0x29   :  { %224 = vmatprep.subr.bf16.mxu0 %v340_v0  ;;  %260 = vtanh.f32 %v42_v3  ;;  %s308_s7 = scalar_lea.vmem %s153_s6, 256  ;;  %p313_p3 = scmp.lt.s32.totalorder %s153_s6, %s153_s6 }
  0x2a   :  { %262 = vtanh.f32 %v43_v4  ;;  %p309_p2 = scmp.ne.s32.totalorder %s153_s6, %s308_s7  ;;  %p314_p4 = scmp.lt.s32.totalorder %s308_s7, %s308_s7 }
  0x2c   :  { %225 = vmatpush3.bf16.msra.mxu0 %v340_v0  ;;  %p315_p5 = por %p314_p4, %p313_p3 }
  0x2e   :  { %p316_p6 = pnand %p315_p5, %p309_p2 }
  0x31   :  { %v257_v6 = vpop.eup %256 }
  0x32   :  { %v259_v7 = vpop.eup %258  ;;  %v48_v8 = vmul.f32 2.0, %v257_v6 }
  0x33   :  { %v261_v9 = vpop.eup %260  ;;  %v226_v10 = vpack.c.bf16 %v259_v7, %v257_v6  ;;  %v49_v11 = vmul.f32 2.0, %v259_v7 }
  0x34   :  { %v263_v12 = vpop.eup %262  ;;  %v52_v13 = vmul.f32 %v257_v6, %v48_v8  ;;  %v50_v14 = vmul.f32 2.0, %v261_v9 }
  0x35   :  { %227 = vmatprep.subr.bf16.mxu0 %v226_v10  ;;  %v230_v15 = vpack.c.bf16 %v263_v12, %v261_v9  ;;  %v53_v16 = vmul.f32 %v259_v7, %v49_v11  ;;  %v51_v17 = vmul.f32 2.0, %v263_v12 }
  0x36   :  { %229 = vmatpush3.bf16.msra.mxu0 %v226_v10  ;;  %v165_v18 = vadd.f32 -1.0, %v52_v13  ;;  %v54_v19 = vmul.f32 %v261_v9, %v50_v14 }
  0x37   :  { %231 = vmatprep.subr.bf16.mxu0 %v230_v15  ;;  %v166_v20 = vadd.f32 -1.0, %v53_v16  ;;  %v55_v21 = vmul.f32 %v263_v12, %v51_v17 }
  0x38   :  { %v167_v22 = vadd.f32 -1.0, %v54_v19  ;;  %v60_v23 = vmul.f32 %v165_v18, %v48_v8 }
  0x39   :  { %v234_v24 = vpack.c.bf16 %v166_v20, %v165_v18  ;;  %v168_v25 = vadd.f32 -1.0, %v55_v21  ;;  %v61_v26 = vmul.f32 %v166_v20, %v49_v11 }
  0x3a   :  { %233 = vmatpush3.bf16.msra.mxu0 %v230_v15  ;;  %v64_v27 = vsub.f32 %v60_v23, %v257_v6  ;;  %v62_v30 = vmul.f32 %v167_v22, %v50_v14 }
  0x3b   :  { %235 = vmatprep.subr.bf16.mxu0 %v234_v24  ;;  %v238_v28 = vpack.c.bf16 %v168_v25, %v167_v22  ;;  %v65_v29 = vsub.f32 %v61_v26, %v259_v7  ;;  %v63_v31 = vmul.f32 %v168_v25, %v51_v17 }
  0x3c   :  { %v66_v33 = vsub.f32 %v62_v30, %v261_v9 }
  0x3d   :  { %v242_v32 = vpack.c.bf16 %v65_v29, %v64_v27  ;;  %v67_v34 = vsub.f32 %v63_v31, %v263_v12 }
  0x3e   :  { %237 = vmatpush3.bf16.msra.mxu0 %v234_v24 }
  0x3f   :  { %239 = vmatprep.subr.bf16.mxu0 %v238_v28  ;;  %v246_v35 = vpack.c.bf16 %v67_v34, %v66_v33 }
  0x42   :  { %241 = vmatpush3.bf16.msra.mxu0 %v238_v28 }
  0x43   :  { %243 = vmatprep.subr.bf16.mxu0 %v242_v32 }
  0x46   :  { %245 = vmatpush3.bf16.msra.mxu0 %v242_v32 }
  0x47   :  { %247 = vmatprep.subr.bf16.mxu0 %v246_v35 }
  0x4a   :  { %249 = vmatpush3.bf16.msra.mxu0 %v246_v35 }
  0x4d   :  { %220 = vmatmul.mubr.f32.vlgmr.msra.gmra.mrb[0].mxu0 %v69_v36 }
 0x120   :  { %v221_v37 = vpop.f32.mrb[0].mxu0 }
 0x121   :  { %146 = vst [vmem:[#allocation7 + $0x8] sm:$0xff] %v221_v37  ;;  %v136_v38 = vpop.f32.mrb[1].mxu0 }
 0x122   :  { %145 = vst [vmem:[#allocation7] sm:$0xff] %v136_v38 }
 0x123   :  { %319 = shalt.err (!%p316_p6)
}
 0x124   :  { %s320_s10 = scalar_lea.hbm %s404_s2, 256 }
 0x125   :  { %p321_p7 = scmp.ne.s32.totalorder %s404_s2, %s320_s10  ;;  %p324_p8 = scmp.lt.u32.totalorder %s320_s10, %s404_s2 }
 0x127   :  { %p326_p9 = pnand %p324_p8, %p321_p7 }
 0x129   :  { %329 = shalt.err (!%p326_p9)
}
 0x12a   :  { %158 = dma.vmem_to_hbm [thread:$0]  %s153_s6, 256, %s404_s2, [#allocation4], %s337_s19, %s337_s19, %s338_s20  }
 0x12b   :  { %334 = dma.done.wait [#allocation4], 256  }
 0x12c   :  { %335 = vsyncadd [#allocation4], 4294967040 }
 0x12d   :  { %162 = vsyncpa [#allocation3], 1 }
 0x12e   :  { %163 = vsyncpa [#allocation6], 1 }
 0x12f   :  { %164 = vsyncpa [#allocation4], 1 }

</bundles_post_ra>
